<compile_context>
chip_gen: v7x
topology: tpu7x:2x2x1
jax: 0.10.0
libtpu: 0.0.40
codegen_flags: <defaults>
</compile_context>

<pallas_src>
import functools

import jax
import jax.numpy as jnp
from jax.experimental import pallas as pl
from jax.experimental.pallas import tpu as pltpu


def _round_up(x, m):
    return ((x + m - 1) // m) * m


# ---------------------------------------------------------------------------
# Kernel
# ---------------------------------------------------------------------------
def highway_kernel(x_ref, w_ref, b_ref, o_ref):
    x = x_ref[...]                                     # (tm, e), I/O dtype
    # Fused matmul: (tm, e) @ (e, 2*e_pad) -> (tm, 2*e_pad), f32 accumulation.
    acc = jnp.dot(x.astype(w_ref.dtype), w_ref[...],
                  preferred_element_type=jnp.float32)
    acc = acc + b_ref[...].astype(jnp.float32)         # (1, 2*e_pad) broadcast

    e = o_ref.shape[-1]
    e_pad = w_ref.shape[-1] // 2
    x_proj = jnp.maximum(acc[:, :e], 0.0)              # relu branch (VPU)
    x_gate = jax.nn.sigmoid(acc[:, e_pad:e_pad + e])   # gate branch (EUP)

    xf = x.astype(jnp.float32)
    # gate*proj + (1-gate)*x  ==  x + gate*(proj - x)
    o_ref[...] = (xf + x_gate * (x_proj - xf)).astype(o_ref.dtype)


# ---------------------------------------------------------------------------
# Generation-aware configuration
# ---------------------------------------------------------------------------
@functools.lru_cache(maxsize=1)
def _vmem_config():
    """Returns (tiling budget, scoped vmem limit) in bytes."""
    try:
        cap = int(pltpu.get_tpu_info().vmem_capacity_bytes)
    except Exception:
        cap = 64 * 1024 * 1024                      # conservative (v7x phys.)
    if cap >= 100 * 1024 * 1024:                    # v5e / v6e: 128 MiB phys.
        return 80 * 1024 * 1024, 96 * 1024 * 1024
    return 24 * 1024 * 1024, 32 * 1024 * 1024       # v7x: 64 MiB / 32 scoped


@functools.lru_cache(maxsize=1)
def _single_buffer_supported():
    """Probe once whether pipeline_mode=pl.Buffered(1) lowers on this setup."""
    try:
        def k(x_ref, o_ref):
            o_ref[...] = x_ref[...] + 1.0

        fn = pl.pallas_call(
            k,
            out_shape=jax.ShapeDtypeStruct((8, 128), jnp.float32),
            grid=(1,),
            in_specs=[pl.BlockSpec((8, 128), lambda i: (0, 0),
                                   pipeline_mode=pl.Buffered(1))],
            out_specs=pl.BlockSpec((8, 128), lambda i: (0, 0)),
        )
        jax.block_until_ready(fn(jnp.zeros((8, 128), jnp.float32)))
        return True
    except Exception:
        return False


def _choose_tm(M, e, e_pad, x_itemsize, w_itemsize, weight_buffers,
               vmem_budget):
    """Largest row tile (multiple of 8) fitting the VMEM budget."""
    if M <= 8:
        return max(int(M), 1)
    resident = weight_buffers * (e * 2 * e_pad * w_itemsize + 2 * e_pad * 4)
    remaining = max(vmem_budget - resident, 2 * 1024 * 1024)
    # Per tile row: double-buffered x + out streams (I/O dtype) plus the
    # (tm, 2*e_pad) f32 matmul result and elementwise temporaries.
    per_row = 4 * e * x_itemsize + 12 * e_pad
    tm = min(4096, remaining // per_row)
    # Megacore (v7x: 2 TensorCores shard the "parallel" axis): aim for >= 4
    # grid steps (>= 2 per core) so each core keeps double-buffering its
    # tiles, but keep per-step tiles >= 256 rows.
    if M >= 2048:
        tm = min(tm, max(256, _round_up(pl.cdiv(M, 4), 256)))
    tm = min(int(tm), M)
    return max(8, (tm // 8) * 8)


# ---------------------------------------------------------------------------
# Parameter preparation (hoist out of the forward pass)
# ---------------------------------------------------------------------------
def prepare_highway_params(w_proj, b_proj, w_gate, b_gate, *,
                           matmul_dtype=jnp.bfloat16):
    """Build the fused (e, 2*e_pad) weight and (1, 2*e_pad) f32 bias ONCE.

    w_proj / w_gate are PyTorch nn.Linear weights of shape (out, in) = (e, e);
    PyTorch computes x @ W^T, so the transpose happens here.  proj occupies
    output lanes [0, e_pad), gate lanes [e_pad, 2*e_pad), e_pad = round-up of
    e to 128, keeping the in-kernel split 128-lane aligned without padding the
    streamed x / out arrays.  matmul_dtype=jnp.bfloat16 (default) runs the MXU
    in its native dtype with f32 accumulation; use jnp.float32 for exact f32.
    """
    e = w_proj.shape[0]
    e_pad = _round_up(e, 128)
    wdt = jnp.promote_types(w_proj.dtype, w_gate.dtype)
    w_cat = jnp.zeros((e, 2 * e_pad), wdt)
    w_cat = w_cat.at[:, :e].set(w_proj.T)
    w_cat = w_cat.at[:, e_pad:e_pad + e].set(w_gate.T)
    if matmul_dtype is not None:
        w_cat = w_cat.astype(matmul_dtype)
    b_cat = jnp.zeros((1, 2 * e_pad), jnp.float32)
    b_cat = b_cat.at[0, :e].set(b_proj.astype(jnp.float32))
    b_cat = b_cat.at[0, e_pad:e_pad + e].set(b_gate.astype(jnp.float32))
    return w_cat, b_cat


# ---------------------------------------------------------------------------
# Forward
# ---------------------------------------------------------------------------
def highway_apply(conv_out, w_cat, b_cat, *, tm=None):
    """Highway forward using pre-fused params from prepare_highway_params()."""
    orig_shape = conv_out.shape
    e = orig_shape[-1]
    two_e_pad = w_cat.shape[-1]
    e_pad = two_e_pad // 2
    assert w_cat.shape == (e, two_e_pad) and b_cat.shape == (1, two_e_pad)

    x2d = conv_out.reshape(-1, e)
    M = x2d.shape[0]

    vmem_budget, vmem_limit = _vmem_config()
    single_buf = _single_buffer_supported()
    weight_buffers = 1 if single_buf else 2

    x_item = jnp.dtype(conv_out.dtype).itemsize
    w_item = jnp.dtype(w_cat.dtype).itemsize
    if tm is None:
        tm = _choose_tm(M, e, e_pad, x_item, w_item, weight_buffers,
                        vmem_budget)
    tm = max(1, min(int(tm), M))
    if tm != M:
        tm = max(8, (tm // 8) * 8)      # multiple of 8 unless covering all rows
    grid_m = pl.cdiv(M, tm)             # ragged last block handled by Pallas

    if single_buf:
        w_spec = pl.BlockSpec((e, two_e_pad), lambda i: (0, 0),
                              pipeline_mode=pl.Buffered(1))
        b_spec = pl.BlockSpec((1, two_e_pad), lambda i: (0, 0),
                              pipeline_mode=pl.Buffered(1))
    else:
        # Constant index_map => Pallas skips the re-DMA across grid steps;
        # only the second VMEM buffer is wasted (accounted in _choose_tm).
        w_spec = pl.BlockSpec((e, two_e_pad), lambda i: (0, 0))
        b_spec = pl.BlockSpec((1, two_e_pad), lambda i: (0, 0))

    cost = pl.CostEstimate(
        flops=2 * M * e * two_e_pad + 6 * M * e,
        transcendentals=M * e,
        bytes_accessed=(2 * M * e * x_item
                        + e * two_e_pad * w_item
                        + two_e_pad * 4),
    )

    out2d = pl.pallas_call(
        highway_kernel,
        out_shape=jax.ShapeDtypeStruct((M, e), conv_out.dtype),
        grid_spec=pltpu.PrefetchScalarGridSpec(
            num_scalar_prefetch=0,
            grid=(grid_m,),
            in_specs=[
                pl.BlockSpec((tm, e), lambda i: (i, 0)),   # streamed x tile
                w_spec,                                    # resident fused W
                b_spec,                                    # resident fused b
            ],
            out_specs=pl.BlockSpec((tm, e), lambda i: (i, 0)),
        ),
        compiler_params=pltpu.CompilerParams(
            dimension_semantics=("parallel",),
            vmem_limit_bytes=vmem_limit,
        ),
        cost_estimate=cost,
    )(x2d, w_cat, b_cat)

    return out2d.reshape(orig_shape)


def highway(conv_out, w_proj, b_proj, w_gate, b_gate, *,
            tm=None, matmul_dtype=jnp.bfloat16):
    """Convenience wrapper (PyTorch-parity signature).  For repeated forward
    calls, hoist prepare_highway_params() to parameter-setup time and call
    highway_apply() directly."""
    w_cat, b_cat = prepare_highway_params(w_proj, b_proj, w_gate, b_gate,
                                          matmul_dtype=matmul_dtype)
    return highway_apply(conv_out, w_cat, b_cat, tm=tm)


# ---------------------------------------------------------------------------
# Reference & test
# ---------------------------------------------------------------------------
def highway_ref(conv_out, w_proj, b_proj, w_gate, b_gate):
    """Pure-JAX reference mirroring the PyTorch forward."""
    x_proj = jax.nn.relu(conv_out @ w_proj.T + b_proj)
    x_gate = jax.nn.sigmoid(conv_out @ w_gate.T + b_gate)
    return x_gate * x_proj + (1.0 - x_gate) * conv_out


def _make_params(key, e_word):
    k_wp, k_bp, k_wg, k_bg = jax.random.split(key, 4)
    bound = 1.0 / (e_word ** 0.5)
    w_proj = jax.random.uniform(k_wp, (e_word, e_word), jnp.float32, -bound, bound)
    b_proj = jax.random.uniform(k_bp, (e_word,), jnp.float32, -bound, bound)
    w_gate = jax.random.uniform(k_wg, (e_word, e_word), jnp.float32, -bound, bound)
    b_gate = jax.random.uniform(k_bg, (e_word,), jnp.float32, -bound, bound)
    return w_proj, b_proj, w_gate, b_gate


if __name__ == "__main__":
    key = jax.random.PRNGKey(0)

    # Case 1: original toy shape (batch=2, seq=4, e_word=64), exact f32 matmul.
    e_word = 64
    k_x, k_p, key = jax.random.split(key, 3)
    conv_out = jax.random.normal(k_x, (2, 4, e_word), dtype=jnp.float32)
    params = _make_params(k_p, e_word)
    out = jax.block_until_ready(
        highway(conv_out, *params, matmul_dtype=jnp.float32))
    ref = highway_ref(conv_out, *params)
    assert out.shape == conv_out.shape
    assert jnp.allclose(out, ref, atol=1e-5, rtol=1e-5), "mismatch (case 1)"

    # Case 2: ragged M (=15) and non-128 e_word (48): partial row block and
    # masked lane stores, no wrapper padding.  f32 matmul, tight tolerance.
    e_word2 = 48
    k_x2, k_p2, key = jax.random.split(key, 3)
    conv_out2 = jax.random.normal(k_x2, (3, 5, e_word2), dtype=jnp.float32)
    params2 = _make_params(k_p2, e_word2)
    w_cat2, b_cat2 = prepare_highway_params(*params2, matmul_dtype=jnp.float32)
    out2 = jax.block_until_ready(highway_apply(conv_out2, w_cat2, b_cat2))
    ref2 = highway_ref(conv_out2, *params2)
    assert out2.shape == conv_out2.shape
    assert jnp.allclose(out2, ref2, atol=1e-5, rtol=1e-5), "mismatch (case 2)"

    # Case 3: multi-step grid with ragged last block (M=80, tm=32 -> 3 steps,
    # 16 valid rows in the last), resident weight reused across steps, and the
    # default bf16 MXU operands (f32 accumulation) -> loosened tolerance.
    k_x3, k_p3, key = jax.random.split(key, 3)
    conv_out3 = jax.random.normal(k_x3, (2, 40, e_word), dtype=jnp.float32)
    params3 = _make_params(k_p3, e_word)
    w_cat3, b_cat3 = prepare_highway_params(*params3)   # bf16 default
    out3 = jax.block_until_ready(highway_apply(conv_out3, w_cat3, b_cat3, tm=32))
    ref3 = highway_ref(conv_out3, *params3)
    assert out3.shape == conv_out3.shape
    assert jnp.allclose(out3, ref3, atol=3e-2, rtol=3e-2), "mismatch (case 3)"

    print("KERNEL_OK")
</pallas_src>

<mosaic_0001>
module attributes {stable_mosaic.version = 11 : i64} {
  func.func @k(%arg0: i32, %arg1: memref<8x128xf32, #tpu.memory_space<vmem>>, %arg2: memref<8x128xf32, #tpu.memory_space<vmem>>) attributes {dimension_semantics = [#tpu.dimension_semantics<arbitrary>], iteration_bounds = array<i64: 1>, scalar_prefetch = 0 : i64, scratch_operands = 0 : i64, tpu.core_type = #tpu.core_type<tc>, window_params = [{pipeline_mode = #tpu.pipeline_mode<synchronous>, transform_indices = @transform_0, window_bounds = array<i64: 8, 128>}, {pipeline_mode = #tpu.pipeline_mode<synchronous>, transform_indices = @transform_1, window_bounds = array<i64: 8, 128>}]} {
    %c0 = arith.constant 0 : index
    %c0_0 = arith.constant 0 : index
    %0 = vector.load %arg1[%c0, %c0_0] : memref<8x128xf32, #tpu.memory_space<vmem>>, vector<8x128xf32>
    %cst = arith.constant 1.000000e+00 : f32
    %1 = vector.broadcast %cst : f32 to vector<8x128xf32>
    %2 = arith.addf %0, %1 : vector<8x128xf32>
    %c0_1 = arith.constant 0 : index
    %c0_2 = arith.constant 0 : index
    %3 = vector.load %arg2[%c0_1, %c0_2] : memref<8x128xf32, #tpu.memory_space<vmem>>, vector<8x128xf32>
    tpu.vector_store %arg2[%c0_1, %c0_2], %2 {strides = array<i32>} : memref<8x128xf32, #tpu.memory_space<vmem>>, vector<8x128xf32>,
    return
  }
  func.func @transform_0(%arg0: i32) -> (i32, i32) {
    %c0_i32 = arith.constant 0 : i32
    %c0_i32_0 = arith.constant 0 : i32
    %c0_i32_1 = arith.constant 0 : i32
    return %c0_i32, %c0_i32_0 : i32, i32
  }
  func.func @transform_1(%arg0: i32) -> (i32, i32) {
    %c0_i32 = arith.constant 0 : i32
    %c0_i32_0 = arith.constant 0 : i32
    %c0_i32_1 = arith.constant 0 : i32
    return %c0_i32, %c0_i32_0 : i32, i32
  }
}

module attributes {stable_mosaic.version = 11 : i64} {
  func.func @highway_kernel(%arg0: i32, %arg1: memref<8x64xf32, #tpu.memory_space<vmem>>, %arg2: memref<64x256xf32, #tpu.memory_space<vmem>>, %arg3: memref<1x256xf32, #tpu.memory_space<vmem>>, %arg4: memref<8x64xf32, #tpu.memory_space<vmem>>) attributes {dimension_semantics = [#tpu.dimension_semantics<parallel>], iteration_bounds = array<i64: 1>, scalar_prefetch = 0 : i64, scratch_operands = 0 : i64, tpu.core_type = #tpu.core_type<tc>, window_params = [{transform_indices = @transform_0, window_bounds = array<i64: 8, 64>}, {pipeline_mode = #tpu.pipeline_mode<synchronous>, transform_indices = @transform_1, window_bounds = array<i64: 64, 256>}, {pipeline_mode = #tpu.pipeline_mode<synchronous>, transform_indices = @transform_2, window_bounds = array<i64: 1, 256>}, {transform_indices = @transform_3, window_bounds = array<i64: 8, 64>}]} {
    %c0 = arith.constant 0 : index
    %c0_0 = arith.constant 0 : index
    %0 = vector.load %arg1[%c0, %c0_0] : memref<8x64xf32, #tpu.memory_space<vmem>>, vector<8x64xf32>
    %c0_1 = arith.constant 0 : index
    %c0_2 = arith.constant 0 : index
    %1 = vector.load %arg2[%c0_1, %c0_2] : memref<64x256xf32, #tpu.memory_space<vmem>>, vector<64x256xf32>
    %cst = arith.constant dense<0.000000e+00> : vector<8x256xf32>
    %2 = tpu.matmul %0, %1, %cst {dimension_numbers = #tpu.dot_dimension_numbers<[1], [0], [0], [1], [0, 0, 1, 1], [], []>} : vector<8x64xf32>, vector<64x256xf32>, vector<8x256xf32> -> vector<8x256xf32>
    %c0_3 = arith.constant 0 : index
    %c0_4 = arith.constant 0 : index
    %3 = vector.load %arg3[%c0_3, %c0_4] : memref<1x256xf32, #tpu.memory_space<vmem>>, vector<1x256xf32>
    %4 = vector.broadcast %3 : vector<1x256xf32> to vector<8x256xf32>
    %5 = arith.addf %2, %4 : vector<8x256xf32>
    %6 = vector.extract_strided_slice %5 {offsets = [0, 0], sizes = [8, 64], strides = [1, 1]} : vector<8x256xf32> to vector<8x64xf32>
    %cst_5 = arith.constant 0.000000e+00 : f32
    %7 = vector.broadcast %cst_5 : f32 to vector<8x64xf32>
    %8 = arith.maximumf %6, %7 : vector<8x64xf32>
    %9 = vector.extract_strided_slice %5 {offsets = [0, 128], sizes = [8, 64], strides = [1, 1]} : vector<8x256xf32> to vector<8x64xf32>
    %10 = arith.negf %9 : vector<8x64xf32>
    %11 = math.exp %10 : vector<8x64xf32>
    %cst_6 = arith.constant 1.000000e+00 : f32
    %12 = vector.broadcast %cst_6 : f32 to vector<8x64xf32>
    %13 = arith.addf %12, %11 : vector<8x64xf32>
    %14 = arith.divf %12, %13 : vector<8x64xf32>
    %15 = arith.subf %8, %0 : vector<8x64xf32>
    %16 = arith.mulf %14, %15 : vector<8x64xf32>
    %17 = arith.addf %0, %16 : vector<8x64xf32>
    %c0_7 = arith.constant 0 : index
    %c0_8 = arith.constant 0 : index
    %18 = vector.load %arg4[%c0_7, %c0_8] : memref<8x64xf32, #tpu.memory_space<vmem>>, vector<8x64xf32>
    tpu.vector_store %arg4[%c0_7, %c0_8], %17 {strides = array<i32>} : memref<8x64xf32, #tpu.memory_space<vmem>>, vector<8x64xf32>,
    return
  }
  func.func @transform_0(%arg0: i32) -> (i32, i32) {
    %c0_i32 = arith.constant 0 : i32
    %c0_i32_0 = arith.constant 0 : i32
    return %arg0, %c0_i32 : i32, i32
  }
  func.func @transform_1(%arg0: i32) -> (i32, i32) {
    %c0_i32 = arith.constant 0 : i32
    %c0_i32_0 = arith.constant 0 : i32
    %c0_i32_1 = arith.constant 0 : i32
    return %c0_i32, %c0_i32_0 : i32, i32
  }
  func.func @transform_2(%arg0: i32) -> (i32, i32) {
    %c0_i32 = arith.constant 0 : i32
    %c0_i32_0 = arith.constant 0 : i32
    %c0_i32_1 = arith.constant 0 : i32
    return %c0_i32, %c0_i32_0 : i32, i32
  }
  func.func @transform_3(%arg0: i32) -> (i32, i32) {
    %c0_i32 = arith.constant 0 : i32
    %c0_i32_0 = arith.constant 0 : i32
    return %arg0, %c0_i32 : i32, i32
  }
}

</mosaic_0001>

<bundles_post_ra>
// kernel: tpu_custom_call.1
= control target key start
LH: loop header
LB: loop body
LE: loop exit
PB: predicated region body
PF: predicated region fallthrough
CT: control target
= control target key end

     0   :  { %6 = vsyncpa [#allocation3], 0  ;;  %s125_s0 = inlined_call_operand.hbm [shape: f32[8,128], index: 0, kind: input, shape index: {}]   ;;  %s126_s1 = inlined_call_operand.hbm [shape: f32[8,128], index: 1, kind: output, shape index: {}]  }
   0x1   :  { %7 = vsyncpa [#allocation4], 0  ;;  %s89_s6 = smov [#allocation2]   ;;  %s41_s10 = scalar_lea.hbm %s125_s0, 128 }
   0x2   :  { %s14_s7 = sshll.u32 %s89_s6, 4  ;;  %p42_p0 = scmp.ne.s32.totalorder %s125_s0, %s41_s10  ;;  %s15_s7 = int_to_ptr.vmem [resolvable:$true] %s14_s7 }
   0x3   :  { %p45_p1 = scmp.lt.u32.totalorder %s41_s10, %s125_s0 }
   0x5   :  { %p47_p2 = pnand %p45_p1, %p42_p0 }
   0x7   :  { %50 = shalt.err (!%p47_p2)
}
   0x8   :  { %s51_s15 = scalar_lea.vmem %s15_s7, 128  ;;  %p56_p4 = scmp.lt.s32.totalorder %s15_s7, %s15_s7 }
   0x9   :  { %p52_p3 = scmp.ne.s32.totalorder %s15_s7, %s51_s15  ;;  %p57_p5 = scmp.lt.s32.totalorder %s51_s15, %s51_s15 }
   0xb   :  { %p58_p6 = por %p57_p5, %p56_p4 }
   0xd   :  { %p59_p7 = pnand %p58_p6, %p52_p3 }
   0xf   :  { %62 = shalt.err (!%p59_p7)
}
  0x10   :  { %17 = dma.hbm_to_vmem [thread:$0]  %s125_s0, 128, %s15_s7, [#allocation3]  }
  0x11   :  { %85 = dma.done.wait [#allocation3], 128  }
  0x12   :  { %86 = vsyncadd [#allocation3], 4294967168  ;;  %s90_s18 = smov [#allocation5]   ;;  %v21_v0 = vld [vmem:[#allocation2] sm:$0xff] }
  0x13   :  { %s30_s19 = sshll.u32 %s90_s18, 4  ;;  %v22_v1 = vadd.f32 1.0, %v21_v0  ;;  %s31_s19 = int_to_ptr.vmem [resolvable:$true] %s30_s19 }
  0x14   :  { %s63_s20 = scalar_lea.vmem %s31_s19, 128  ;;  %p68_p9 = scmp.lt.s32.totalorder %s31_s19, %s31_s19 }
  0x15   :  { %23 = vst [vmem:[#allocation5] sm:$0xff] %v22_v1  ;;  %p64_p8 = scmp.ne.s32.totalorder %s31_s19, %s63_s20  ;;  %p69_p10 = scmp.lt.s32.totalorder %s63_s20, %s63_s20 }
  0x17   :  { %p70_p11 = por %p69_p10, %p68_p9 }
  0x19   :  { %p71_p12 = pnand %p70_p11, %p64_p8 }
  0x1b   :  { %74 = shalt.err (!%p71_p12)
}
  0x1c   :  { %s75_s23 = scalar_lea.hbm %s126_s1, 128 }
  0x1d   :  { %p76_p13 = scmp.ne.s32.totalorder %s126_s1, %s75_s23  ;;  %p79_p0 = scmp.lt.u32.totalorder %s75_s23, %s126_s1 }
  0x1f   :  { %p81_p1 = pnand %p79_p0, %p76_p13 }
  0x21   :  { %84 = shalt.err (!%p81_p1)
}
  0x22   :  { %33 = dma.vmem_to_hbm [thread:$0]  %s31_s19, 128, %s126_s1, [#allocation4]  }
  0x23   :  { %87 = dma.done.wait [#allocation4], 128  }
  0x24   :  { %88 = vsyncadd [#allocation4], 4294967168 }
  0x25   :  { %37 = vsyncpa [#allocation3], 1 }
  0x26   :  { %38 = vsyncpa [#allocation4], 1 }

// kernel: tpu_custom_call.1
= control target key start
LH: loop header
LB: loop body
LE: loop exit
PB: predicated region body
PF: predicated region fallthrough
CT: control target
= control target key end

     0   :  { %8 = vsyncpa [#allocation3], 0  ;;  %s346_s0 = inlined_call_operand.hbm [shape: f32[8,64], index: 0, kind: input, shape index: {}]   ;;  %s347_s1 = inlined_call_operand.hbm [shape: f32[64,256], index: 1, kind: input, shape index: {}]   ;;  %s348_s2 = inlined_call_operand.vmem [shape: f32[1,256], index: 2, kind: input, shape index: {}]   ;;  %s349_s3 = inlined_call_operand.hbm [shape: f32[8,64], index: 3, kind: output, shape index: {}]  }
   0x1   :  { %9 = vsyncpa [#allocation6], 0 }
   0x2   :  { %10 = vsyncpa [#allocation4], 0  ;;  %s272_s12 = smov [#allocation2]   ;;  %s273_s14 = smov [#allocation5]  }
   0x3   :  { %s17_s13 = sshll.u32 %s272_s12, 4  ;;  %s26_s15 = sshll.u32 %s273_s14, 4  ;;  %s18_s13 = int_to_ptr.vmem [resolvable:$true] %s17_s13  ;;  %s298_s15 = int_to_ptr.vmem [resolvable:$true] %s26_s15 }
   0x4   :  { %s200_s18 = scalar_lea.hbm %s346_s0, 128 }
   0x5   :  { %p201_p0 = scmp.ne.s32.totalorder %s346_s0, %s200_s18  ;;  %p204_p1 = scmp.lt.u32.totalorder %s200_s18, %s346_s0 }
   0x7   :  { %p206_p2 = pnand %p204_p1, %p201_p0 }
   0x9   :  { %209 = shalt.err (!%p206_p2)
}
   0xa   :  { %s210_s23 = scalar_lea.vmem %s18_s13, 128  ;;  %p215_p4 = scmp.lt.s32.totalorder %s18_s13, %s18_s13 }
   0xb   :  { %p211_p3 = scmp.ne.s32.totalorder %s18_s13, %s210_s23  ;;  %p216_p5 = scmp.lt.s32.totalorder %s210_s23, %s210_s23 }
   0xd   :  { %p217_p6 = por %p216_p5, %p215_p4 }
   0xf   :  { %p218_p7 = pnand %p217_p6, %p211_p3 }
  0x11   :  { %221 = shalt.err (!%p218_p7)
}
  0x12   :  { %20 = dma.hbm_to_vmem [thread:$0]  %s346_s0, 128, %s18_s13, [#allocation3]  }
  0x13   :  { %s222_s28 = scalar_lea.hbm %s347_s1, 2048 }
  0x14   :  { %p223_p8 = scmp.ne.s32.totalorder %s347_s1, %s222_s28  ;;  %p226_p9 = scmp.lt.u32.totalorder %s222_s28, %s347_s1 }
  0x16   :  { %p228_p10 = pnand %p226_p9, %p223_p8 }
  0x18   :  { %231 = shalt.err (!%p228_p10)
}
  0x19   :  { %s232_s6 = scalar_lea.vmem %s298_s15, 2048  ;;  %p237_p12 = scmp.lt.s32.totalorder %s298_s15, %s298_s15 }
  0x1a   :  { %p233_p11 = scmp.ne.s32.totalorder %s298_s15, %s232_s6  ;;  %p238_p13 = scmp.lt.s32.totalorder %s232_s6, %s232_s6 }
  0x1c   :  { %p239_p0 = por %p238_p13, %p237_p12 }
  0x1e   :  { %p240_p1 = pnand %p239_p0, %p233_p11 }
  0x20   :  { %243 = shalt.err (!%p240_p1)
}
  0x21   :  { %s274_s0 = smov 256   ;;  %s275_s7 = smov 16  }
  0x22   :  { %32 = dma.hbm_to_vmem [thread:$0]  %s347_s1, 2048, %s298_s15, [#allocation6], %s274_s0, %s274_s0, %s275_s7  }
  0x23   :  { %266 = dma.done.wait [#allocation3], 128  }
  0x24   :  { %267 = vsyncadd [#allocation3], 4294967168 }
  0x25   :  { %268 = dma.done.wait [#allocation6], 2048  }
  0x26   :  { %269 = vsyncadd [#allocation6], 4294965248  ;;  %v276_v0 = vmov 0.0   ;;  %v43_v1 = vld [vmem:[#allocation5 + $0x8] sm:$0xff]  ;;  %v45_v2 = vld [vmem:[#allocation5 + $0x18] sm:$0xff]  ;;  %vm70_vm0 = vcmask 523264   ;;  %v60_v26 = vlaneseq }
  0x27   :  { %138 = vmatprep.mubr.f32.mxu0 %v276_v0  ;;  %v42_v3 = vld [vmem:[#allocation5] sm:$0xff]  ;;  %v174_v4 = vpack.c.bf16 %v45_v2, %v43_v1  ;;  %v44_v5 = vld [vmem:[#allocation5 + $0x10] sm:$0xff]  ;;  %v47_v6 = vld [vmem:[#allocation5 + $0x28] sm:$0xff]  ;;  %s277_s11 = smov [#allocation7]  }
  0x28   :  { %v49_v7 = vld [vmem:[#allocation5 + $0x38] sm:$0xff]  ;;  %v176_v8 = vpack.c.bf16 %v44_v5, %v42_v3  ;;  %v46_v10 = vld [vmem:[#allocation5 + $0x20] sm:$0xff]  ;;  %v48_v11 = vld [vmem:[#allocation5 + $0x30] sm:$0xff]  ;;  %v61_v27 = vshrl.u32 %v60_v26, 7  ;;  %s162_s12 = sshll.u32 %s277_s11, 4  ;;  %s163_s12 = int_to_ptr.vmem [resolvable:$true] %s162_s12 }
  0x29   :  { %v178_v9 = vpack.c.bf16 %v49_v7, %v47_v6  ;;  %v51_v12 = vld [vmem:[#allocation5 + $0x48] sm:$0xff]  ;;  %175 = vmatprep.subr.bf16.mxu0 %v174_v4  ;;  %v53_v13 = vld [vmem:[#allocation5 + $0x58] sm:$0xff]  ;;  %v180_v14 = vpack.c.bf16 %v48_v11, %v46_v10  ;;  %v50_v16 = vld [vmem:[#allocation5 + $0x40] sm:$0xff]  ;;  %p249_p3 = scmp.lt.s32.totalorder %s163_s12, %s163_s12 }
  0x2a   :  { %177 = vmatpush1.bf16.msra.mxu0 %v176_v8  ;;  %v182_v15 = vpack.c.bf16 %v53_v13, %v51_v12  ;;  %v52_v17 = vld [vmem:[#allocation5 + $0x50] sm:$0xff]  ;;  %v55_v18 = vld [vmem:[#allocation5 + $0x68] sm:$0xff]  ;;  %v57_v19 = vld [vmem:[#allocation5 + $0x78] sm:$0xff]  ;;  %v66_v28 = vsub.s32 1, %v61_v27  ;;  %v62_v35 = vsub.s32 0, %v61_v27 }
  0x2b   :  { %179 = vmatprep.subr.bf16.mxu0 %v178_v9  ;;  %v184_v20 = vpack.c.bf16 %v52_v17, %v50_v16  ;;  %v186_v21 = vpack.c.bf16 %v57_v19, %v55_v18  ;;  %v54_v22 = vld [vmem:[#allocation5 + $0x60] sm:$0xff]  ;;  %v56_v23 = vld [vmem:[#allocation5 + $0x70] sm:$0xff]  ;;  %v41_v25 = vld [vmem:[#allocation2] sm:$0xff] }
  0x2c   :  { %v188_v24 = vpack.c.bf16 %v56_v23, %v54_v22  ;;  %v58_v29 = vld [vmem:[%s348_s2] sm:$0x3]  ;;  %s244_s2 = scalar_lea.vmem %s163_s12, 128 }
  0x2d   :  { %v67_v30 = vrot.slane %v58_v29, %v66_v28  ;;  %v63_v37 = vrot.slane %v58_v29, %v62_v35  ;;  %p245_p2 = scmp.ne.s32.totalorder %s163_s12, %s244_s2  ;;  %p250_p4 = scmp.lt.s32.totalorder %s244_s2, %s244_s2 }
  0x2e   :  { %181 = vmatpush1.bf16.msra.mxu0 %v180_v14 }
  0x2f   :  { %183 = vmatprep.subr.bf16.mxu0 %v182_v15  ;;  %p251_p5 = por %p250_p4, %p249_p3 }
  0x31   :  { %p252_p6 = pnand %p251_p5, %p245_p2 }
  0x32   :  { %185 = vmatpush1.bf16.msra.mxu0 %v184_v20 }
  0x33   :  { %187 = vmatprep.subr.bf16.mxu0 %v186_v21 }
  0x36   :  { %189 = vmatpush1.bf16.msra.mxu0 %v188_v24 }
  0x39   :  { %172 = vmatmul.mubr.msk.f32.vlgmr.msra.gmra.mrb[0].mxu0 %vm70_vm0, %v41_v25 }
 0x10c   :  { %v140_v31 = vpop.f32.mrb[0].mxu0 }
 0x10d   :  { %v142_v32 = vpop.f32.mrb[1].mxu0  ;;  %v141_v39 = vadd.f32 %v140_v31, %v63_v37 }
 0x10e   :  { %v143_v33 = vadd.f32 %v142_v32, %v67_v30 }
 0x10f   :  { %v145_v40 = vmax.f32 %v141_v39, 0.0 }
 0x110   :  { %v173_v34 = vmul.f32 -1.442695, %v143_v33 }
 0x111   :  { %v152_v41 = vsub.f32 %v145_v40, %v41_v25 }
 0x112   :  { %196 = vpow2.f32 %v173_v34 }
 0x11c   :  { %v197_v36 = vpop.eup %196 }
 0x11d   :  { %v149_v38 = vadd.f32 1.0, %v197_v36 }
 0x11f   :  { %198 = vrcp.f32 %v149_v38 }
 0x129   :  { %v199_v42 = vpop.eup %198 }
 0x12a   :  { %v153_v43 = vmul.f32 %v199_v42, %v152_v41 }
 0x12c   :  { %v154_v44 = vadd.f32 %v153_v43, %v41_v25 }
 0x12e   :  { %155 = vst.msk [vmem:[#allocation7] sm:$0xff] %vm70_vm0, %v154_v44 }
 0x12f   :  { %255 = shalt.err (!%p252_p6)
}
 0x130   :  { %s256_s15 = scalar_lea.hbm %s349_s3, 128 }
 0x131   :  { %p257_p7 = scmp.ne.s32.totalorder %s349_s3, %s256_s15  ;;  %p260_p8 = scmp.lt.u32.totalorder %s256_s15, %s349_s3 }
 0x133   :  { %p262_p9 = pnand %p260_p8, %p257_p7 }
 0x135   :  { %265 = shalt.err (!%p262_p9)
}
 0x136   :  { %165 = dma.vmem_to_hbm [thread:$0]  %s163_s12, 128, %s349_s3, [#allocation4]  }
 0x137   :  { %270 = dma.done.wait [#allocation4], 128  }
 0x138   :  { %271 = vsyncadd [#allocation4], 4294967168 }
 0x139   :  { %169 = vsyncpa [#allocation3], 1 }
 0x13a   :  { %170 = vsyncpa [#allocation6], 1 }
 0x13b   :  { %171 = vsyncpa [#allocation4], 1 }

</bundles_post_ra>
